<compile_context>
chip_gen: v6e
topology: v6e:2x2x1
jax: 0.10.0
libtpu: 0.0.40
codegen_flags: <defaults>
</compile_context>

<pallas_src>
import math
from functools import partial

import jax
import jax.numpy as jnp
from jax.experimental import pallas as pl
from jax.experimental.pallas import tpu as pltpu


def _round_up(x, m):
    return ((x + m - 1) // m) * m


def _nbytes(dt):
    return jnp.dtype(dt).itemsize


def _pick_row_tile(n):
    """Row tile for the adjacency/output blocks (N-tile axis for large graphs)."""
    if n <= 1024:
        return n
    for t in (512, 256, 128):
        if n % t == 0:
            return t
    # TODO(synk): ragged large N falls back to full rows; pad N upstream if needed.
    return n


def _pick_batch_tile(b, n, target_rows=512):
    """Largest divisor of B with Bt*N rows bounded (dense MXU rows, bounded VMEM)."""
    best = 1
    cap = max(target_rows, n)
    for bt in range(1, b + 1):
        if b % bt == 0 and bt * n <= cap:
            best = bt
    return best


def _rgcn_kernel(x_ref, adj_ref, w_ref, *rest, use_relu, has_bias):
    # x_ref:   (Bt, N, D)        VMEM, native dtype (revisited across N-tiles)
    # adj_ref: (Bt, tn, N)       VMEM, native dtype
    # w_ref:   (D, H_pad)        VMEM, resident
    # [b_ref]: (1, H_pad)        VMEM (only if has_bias)
    # o_ref:   (Bt, tn, H_pad)   VMEM
    # sup_ref: (Bt, N, H_pad)    VMEM scratch, dtype == adj dtype
    if has_bias:
        b_ref, o_ref, sup_ref = rest
    else:
        o_ref, sup_ref = rest
        b_ref = None

    n_idx = pl.program_id(1)

    # support = x @ W, computed once per batch block (first N-tile), cached in VMEM.
    @pl.when(n_idx == 0)
    def _():
        bt, n_nodes, d = x_ref.shape
        x2d = x_ref[...].reshape(bt * n_nodes, d)      # pack Bt*N rows -> dense MXU call
        sup = jnp.dot(x2d, w_ref[...], preferred_element_type=jnp.float32)
        sup_ref[...] = sup.reshape(bt, n_nodes, -1).astype(sup_ref.dtype)

    # out_tile = adj_tile @ support   (native dtypes into the MXU, f32 accumulation)
    out = jnp.einsum(
        "bij,bjh->bih", adj_ref[...], sup_ref[...],
        preferred_element_type=jnp.float32)

    if has_bias:
        out = out + b_ref[...].astype(jnp.float32)
    if use_relu:
        out = jnp.maximum(out, 0.0)

    o_ref[...] = out.astype(o_ref.dtype)


@partial(jax.jit, static_argnames=("use_relu",))
def relation_graph_conv(x, adj, weight, bias=None, *, use_relu=True):
    """out = act(adj @ (x @ weight) [+ bias]).

    x: (B, N, D), adj: (B, N, N), weight: (D, H), bias: (H,) or None.
    Returns (B, N, H) in x.dtype.
    """
    B, N, D = x.shape
    Dw, H = weight.shape
    assert Dw == D, "weight in_features must match x feature dim"
    has_bias = bias is not None

    if not jnp.issubdtype(adj.dtype, jnp.floating):
        adj = adj.astype(x.dtype)

    # Lane-dense output: pad H up to a multiple of 128 with zero weight/bias columns.
    H_pad = _round_up(H, 128)
    if H_pad != H:
        weight = jnp.pad(weight, ((0, 0), (0, H_pad - H)))
        if has_bias:
            bias = jnp.pad(bias, (0, H_pad - H))

    tn = _pick_row_tile(N)
    Bt = _pick_batch_tile(B, N)
    sup_dtype = adj.dtype  # second-matmul operands match adj's native dtype (no cast)

    xb, ab = _nbytes(x.dtype), _nbytes(adj.dtype)
    wb, ob, sb = _nbytes(weight.dtype), _nbytes(x.dtype), _nbytes(sup_dtype)

    # Scoped-VMEM sizing from the actual block footprint (+double buffering + headroom).
    block_bytes = (
        2 * Bt * N * D * xb
        + 2 * Bt * tn * N * ab
        + 2 * Bt * tn * H_pad * ob
        + 2 * D * H_pad * wb
        + Bt * N * H_pad * sb
    )
    if has_bias:
        block_bytes += 2 * H_pad * _nbytes(bias.dtype)
    vmem_limit = int(min(56 << 20, max(32 << 20, block_bytes + (8 << 20))))

    flops = 2 * B * N * H_pad * (D + N)
    bytes_accessed = int(
        x.size * xb + adj.size * ab + weight.size * wb
        + (bias.size * _nbytes(bias.dtype) if has_bias else 0)
        + B * N * H_pad * ob)
    cost = pl.CostEstimate(flops=flops, transcendentals=0,
                           bytes_accessed=bytes_accessed)

    kernel = partial(_rgcn_kernel, use_relu=use_relu, has_bias=has_bias)

    in_specs = [
        pl.BlockSpec((Bt, N, D), lambda b, n: (b, 0, 0)),     # x (held across N-tiles)
        pl.BlockSpec((Bt, tn, N), lambda b, n: (b, n, 0)),    # adj row tile
        pl.BlockSpec((D, H_pad), lambda b, n: (0, 0)),        # weight (resident)
    ]
    args = [x, adj, weight]
    if has_bias:
        in_specs.append(pl.BlockSpec((1, H_pad), lambda b, n: (0, 0)))
        args.append(bias.reshape(1, H_pad))

    out = pl.pallas_call(
        kernel,
        out_shape=jax.ShapeDtypeStruct((B, N, H_pad), x.dtype),
        grid_spec=pltpu.PrefetchScalarGridSpec(
            num_scalar_prefetch=0,
            grid=(B // Bt, N // tn),                  # batch outer, N-tiles inner
            in_specs=in_specs,
            out_specs=pl.BlockSpec((Bt, tn, H_pad), lambda b, n: (b, n, 0)),
            scratch_shapes=[pltpu.VMEM((Bt, N, H_pad), sup_dtype)],
        ),
        compiler_params=pltpu.CompilerParams(
            dimension_semantics=("parallel", "arbitrary"),
            vmem_limit_bytes=vmem_limit,
        ),
        cost_estimate=cost,
    )(*args)

    if H_pad != H:
        out = out[..., :H]
    return out


if __name__ == "__main__":
    key = jax.random.PRNGKey(0)
    k1, k2, k3, k4 = jax.random.split(key, 4)

    # Small shapes consistent with the module's forward: (batch, N, node_features)
    B, N, D, H = 2, 8, 32, 32

    x = jax.random.normal(k1, (B, N, D), dtype=jnp.float32)
    adj = (jax.random.uniform(k2, (B, N, N)) > 0.5).astype(jnp.float32)

    # Xavier-uniform init for weight (as in reset_parameters)
    limit = math.sqrt(6.0 / (D + H))
    weight = jax.random.uniform(k3, (D, H), minval=-limit, maxval=limit,
                                dtype=jnp.float32)

    # Pure-JAX reference (eval-mode forward, dropout p=0)
    support = jnp.einsum("bid,dh->bih", x, weight)
    ref_lin = jnp.einsum("bij,bjh->bih", adj, support)

    # 1) Default config: bias=False, use_relu=True, f32 everywhere.
    out = jax.block_until_ready(relation_graph_conv(x, adj, weight, use_relu=True))
    assert out.shape == (B, N, H)
    assert jnp.allclose(out, jnp.maximum(ref_lin, 0.0), rtol=1e-5, atol=1e-5), \
        "mismatch vs reference (relu, no bias)"

    # 2) bias=True, use_relu=False.
    bias = jax.random.normal(k4, (H,), dtype=jnp.float32)
    out_b = jax.block_until_ready(
        relation_graph_conv(x, adj, weight, bias, use_relu=False))
    assert jnp.allclose(out_b, ref_lin + bias, rtol=1e-5, atol=1e-5), \
        "mismatch vs reference (bias, no relu)"

    # 3) bf16 adjacency fast path (adj is 0/1): native-dtype MXU, looser tolerance.
    adj_bf16 = adj.astype(jnp.bfloat16)
    out_bf = jax.block_until_ready(
        relation_graph_conv(x, adj_bf16, weight, use_relu=True))
    assert jnp.allclose(out_bf.astype(jnp.float32), jnp.maximum(ref_lin, 0.0),
                        rtol=5e-2, atol=5e-2), "mismatch vs reference (bf16 adj)"

    print("KERNEL_OK")
</pallas_src>

<mosaic_0001>
module attributes {stable_mosaic.version = 11 : i64} {
  func.func @_rgcn_kernel(%arg0: i32, %arg1: i32, %arg2: memref<2x8x32xf32, #tpu.memory_space<vmem>>, %arg3: memref<2x8x8xf32, #tpu.memory_space<vmem>>, %arg4: memref<32x128xf32, #tpu.memory_space<vmem>>, %arg5: memref<2x8x128xf32, #tpu.memory_space<vmem>>, %arg6: memref<2x8x128xf32, #tpu.memory_space<vmem>>) attributes {dimension_semantics = [#tpu.dimension_semantics<parallel>, #tpu.dimension_semantics<arbitrary>], iteration_bounds = array<i64: 1, 1>, scalar_prefetch = 0 : i64, scratch_operands = 1 : i64, tpu.core_type = #tpu.core_type<tc>, window_params = [{transform_indices = @transform_0, window_bounds = array<i64: 2, 8, 32>}, {transform_indices = @transform_1, window_bounds = array<i64: 2, 8, 8>}, {pipeline_mode = #tpu.pipeline_mode<synchronous>, transform_indices = @transform_2, window_bounds = array<i64: 32, 128>}, {transform_indices = @transform_3, window_bounds = array<i64: 2, 8, 128>}]} {
    %c0_i32 = arith.constant 0 : i32
    %0 = arith.cmpi eq, %arg1, %c0_i32 : i32
    %1 = arith.extui %0 : i1 to i32
    %c0_i32_0 = arith.constant 0 : i32
    %2 = arith.cmpi ne, %1, %c0_i32_0 : i32
    scf.if %2 {
      %c0_10 = arith.constant 0 : index
      %c0_11 = arith.constant 0 : index
      %c0_12 = arith.constant 0 : index
      %9 = vector.load %arg2[%c0_10, %c0_11, %c0_12] : memref<2x8x32xf32, #tpu.memory_space<vmem>>, vector<2x8x32xf32>
      %10 = vector.shape_cast %9 : vector<2x8x32xf32> to vector<16x32xf32>
      %c0_13 = arith.constant 0 : index
      %c0_14 = arith.constant 0 : index
      %11 = vector.load %arg4[%c0_13, %c0_14] : memref<32x128xf32, #tpu.memory_space<vmem>>, vector<32x128xf32>
      %cst_15 = arith.constant dense<0.000000e+00> : vector<16x128xf32>
      %12 = tpu.matmul %10, %11, %cst_15 {dimension_numbers = #tpu.dot_dimension_numbers<[1], [0], [0], [1], [0, 0, 1, 1], [], []>} : vector<16x32xf32>, vector<32x128xf32>, vector<16x128xf32> -> vector<16x128xf32>
      %13 = vector.shape_cast %12 : vector<16x128xf32> to vector<2x8x128xf32>
      %c0_16 = arith.constant 0 : index
      %c0_17 = arith.constant 0 : index
      %c0_18 = arith.constant 0 : index
      %14 = vector.load %arg6[%c0_16, %c0_17, %c0_18] : memref<2x8x128xf32, #tpu.memory_space<vmem>>, vector<2x8x128xf32>
      tpu.vector_store %arg6[%c0_16, %c0_17, %c0_18], %13 {strides = array<i32>} : memref<2x8x128xf32, #tpu.memory_space<vmem>>, vector<2x8x128xf32>,
    } else {
    }
    %c0 = arith.constant 0 : index
    %c0_1 = arith.constant 0 : index
    %c0_2 = arith.constant 0 : index
    %3 = vector.load %arg3[%c0, %c0_1, %c0_2] : memref<2x8x8xf32, #tpu.memory_space<vmem>>, vector<2x8x8xf32>
    %c0_3 = arith.constant 0 : index
    %c0_4 = arith.constant 0 : index
    %c0_5 = arith.constant 0 : index
    %4 = vector.load %arg6[%c0_3, %c0_4, %c0_5] : memref<2x8x128xf32, #tpu.memory_space<vmem>>, vector<2x8x128xf32>
    "tpu.trace_start"() <{level = 10 : i32, message = "bij,bjh->bih"}> : () -> ()
    %cst = arith.constant dense<0.000000e+00> : vector<2x8x128xf32>
    %5 = tpu.matmul %3, %4, %cst {dimension_numbers = #tpu.dot_dimension_numbers<[2], [1], [1], [2], [0, 0, 0, 1, 1, 2], [0], [0]>} : vector<2x8x8xf32>, vector<2x8x128xf32>, vector<2x8x128xf32> -> vector<2x8x128xf32>
    "tpu.trace_stop"() : () -> ()
    %cst_6 = arith.constant 0.000000e+00 : f32
    %6 = vector.broadcast %cst_6 : f32 to vector<2x8x128xf32>
    %7 = arith.maximumf %5, %6 : vector<2x8x128xf32>
    %c0_7 = arith.constant 0 : index
    %c0_8 = arith.constant 0 : index
    %c0_9 = arith.constant 0 : index
    %8 = vector.load %arg5[%c0_7, %c0_8, %c0_9] : memref<2x8x128xf32, #tpu.memory_space<vmem>>, vector<2x8x128xf32>
    tpu.vector_store %arg5[%c0_7, %c0_8, %c0_9], %7 {strides = array<i32>} : memref<2x8x128xf32, #tpu.memory_space<vmem>>, vector<2x8x128xf32>,
    return
  }
  func.func @transform_0(%arg0: i32, %arg1: i32) -> (i32, i32, i32) {
    %c0_i32 = arith.constant 0 : i32
    %c0_i32_0 = arith.constant 0 : i32
    %c0_i32_1 = arith.constant 0 : i32
    return %arg0, %c0_i32, %c0_i32_0 : i32, i32, i32
  }
  func.func @transform_1(%arg0: i32, %arg1: i32) -> (i32, i32, i32) {
    %c0_i32 = arith.constant 0 : i32
    %c0_i32_0 = arith.constant 0 : i32
    return %arg0, %arg1, %c0_i32 : i32, i32, i32
  }
  func.func @transform_2(%arg0: i32, %arg1: i32) -> (i32, i32) {
    %c0_i32 = arith.constant 0 : i32
    %c0_i32_0 = arith.constant 0 : i32
    %c0_i32_1 = arith.constant 0 : i32
    return %c0_i32, %c0_i32_0 : i32, i32
  }
  func.func @transform_3(%arg0: i32, %arg1: i32) -> (i32, i32, i32) {
    %c0_i32 = arith.constant 0 : i32
    %c0_i32_0 = arith.constant 0 : i32
    return %arg0, %arg1, %c0_i32 : i32, i32, i32
  }
}

</mosaic_0001>

<bundles_post_ra>
// kernel: relation_graph_conv.1
= control target key start
LH: loop header
LB: loop body
LE: loop exit
PB: predicated region body
PF: predicated region fallthrough
CT: control target
= control target key end

     0   :  { %vm25_vm0 = vcmask 261120   ;;  %s394_s0 = inlined_call_operand.vmem [shape: f32[2,8,32], index: 0, kind: input, shape index: {}]   ;;  %s395_s1 = inlined_call_operand.vmem [shape: f32[2,8,8], index: 1, kind: input, shape index: {}]   ;;  %s396_s2 = inlined_call_operand.vmem [shape: f32[32,128], index: 2, kind: input, shape index: {}]   ;;  %s397_s3 = inlined_call_operand.hbm [shape: f32[2,8,128], index: 3, kind: output, shape index: {}]  }
   0x1   :  { %v24_v0 = vld [vmem:[%s396_s2 + $0x18] sm:$0xff]  ;;  %v23_v1 = vld [vmem:[%s396_s2 + $0x10] sm:$0xff]  ;;  %v19_v2 = vld [vmem:[%s394_s0] sm:$0xff] }
   0x2   :  { %294 = vmatprep.subr.mxu0 %v24_v0  ;;  %v22_v3 = vld [vmem:[%s396_s2 + $0x8] sm:$0xff]  ;;  %302 = vmatprep.mubr.msk.f32.mxu0 %vm25_vm0, %v19_v2 }
   0x3   :  { %295 = vmatpush3.msra.mxu0 %v24_v0 }
   0x4   :  { %8 = vsyncpa [#allocation4], 0  ;;  %296 = vmatprep.subr.mxu0 %v23_v1  ;;  %v21_v4 = vld [vmem:[%s396_s2] sm:$0xff]  ;;  %v20_v5 = vld [vmem:[%s394_s0 + $0x8] sm:$0xff]  ;;  %v342_v6 = vmov 0.0   ;;  %vm343_vm1 = vmmov 0  }
   0x5   :  { %297 = vmatpush3.msra.mxu0 %v23_v1  ;;  %305 = vmatprep.subr.mxu1 %v342_v6  ;;  %v109_v8 = vld [vmem:[%s395_s1] sm:$0xff]  ;;  %vm113_vm2 = vcmask 64512   ;;  %v110_v10 = vld [vmem:[%s395_s1 + $0x8] sm:$0xff]  ;;  %s344_s26 = smov [#allocation3]  }
   0x6   :  { %298 = vmatprep.subr.mxu0 %v22_v3  ;;  %307 = vmatprep.mubr.msk.f32.mxu1 %vm343_vm1, %v342_v6  ;;  %s269_s27 = sshll.u32 %s344_s26, 4  ;;  %s270_s27 = int_to_ptr.vmem [resolvable:$true] %s269_s27 }
   0x7   :  { %299 = vmatpush3.msra.mxu0 %v22_v3  ;;  %s320_s28 = scalar_lea.vmem %s270_s27, 256  ;;  %p325_p1 = scmp.lt.s32.totalorder %s270_s27, %s270_s27 }
   0x8   :  { %300 = vmatprep.subr.mxu0 %v21_v4  ;;  %p321_p0 = scmp.ne.s32.totalorder %s270_s27, %s320_s28  ;;  %p326_p2 = scmp.lt.s32.totalorder %s320_s28, %s320_s28 }
   0x9   :  { %301 = vmatpush3.msra.mxu0 %v21_v4 }
   0xa   :  { %303 = vmatmul.mubr.msk.f32.vlgmr.msra.gmra.mxu0 %vm25_vm0, %v20_v5  ;;  %p327_p3 = por %p326_p2, %p325_p1 }
   0xc   :  { %p328_p4 = pnand %p327_p3, %p321_p0 }
  0xca   :  { %v304_v7 = vpop.f32.mrf.mxu0 }
  0xcc   :  { %v98_v9 = vpop.f32.mrf.mxu0 }
  0xcd   :  { %306 = vmatpush3.msra.mxu1 %v98_v9 }
  0xce   :  { %308 = vmatmul.mubr.msk.f32.vlgmr.msra.gmra.mxu1 %vm113_vm2, %v109_v8  ;;  %310 = vmatprep.subr.mxu1 %v342_v6 }
  0xcf   :  { %311 = vmatpush3.msra.mxu1 %v304_v7  ;;  %312 = vmatprep.mubr.msk.f32.mxu1 %vm343_vm1, %v342_v6 }
  0xd2   :  { %313 = vmatmul.mubr.msk.f32.vlgmr.msra.gmra.mxu1 %vm113_vm2, %v110_v10 }
 0x18e   :  { %v183_v11 = vpop.f32.mrf.mxu1 }
 0x18f   :  { %v260_v12 = vmax.f32 %v183_v11, 0.0 }
 0x190   :  { %v309_v13 = vpop.f32.mrf.mxu1 }
 0x191   :  { %262 = vst [vmem:[#allocation3] sm:$0xff] %v260_v12 }
 0x192   :  { %v256_v14 = vpop.f32.mrf.mxu1 }
 0x193   :  { %v261_v15 = vmax.f32 %v256_v14, 0.0 }
 0x194   :  { %v314_v16 = vpop.f32.mrf.mxu1 }
 0x195   :  { %263 = vst [vmem:[#allocation3 + $0x8] sm:$0xff] %v261_v15 }
 0x196   :  { %331 = shalt.err (!%p328_p4)
}
 0x197   :  { %s345_s1 = smov 128   ;;  %s346_s29 = smov 8  }
 0x198   :  { %275 = dma.vmem_to_hbm [thread:$0]  %s270_s27, 256, %s397_s3, [#allocation4], %s345_s1, %s345_s1, %s346_s29  }
 0x199   :  { %340 = dma.done.wait [#allocation4], 256  }
 0x19a   :  { %341 = vsyncadd [#allocation4], 4294967040 }
 0x19b   :  { %279 = vsyncpa [#allocation4], 1 }

</bundles_post_ra>
